<compile_context>
chip_gen: v6e
topology: v6e:2x2x1
jax: 0.10.0
libtpu: 0.0.40
codegen_flags: <defaults>
</compile_context>

<pallas_src>
import functools

import numpy as np
import jax
import jax.numpy as jnp
from jax.experimental import pallas as pl
from jax.experimental.pallas import tpu as pltpu


def _yolo_kernel(x_ref, o_ref, *, nA, bbox_attrs, nG, stride, anchors, s_chunk):
    """Decode one (nBblk, nA*bbox_attrs, s_chunk) tile: one load, one store.

    Per anchor, rows of the attribute axis decode as:
      attr 0: (sigmoid(tx) + grid_x) * stride
      attr 1: (sigmoid(ty) + grid_y) * stride
      attr 2: exp(tw) * anchor_w      (== scaled_anchor_w * stride)
      attr 3: exp(th) * anchor_h
      attr 4+: sigmoid(conf / cls)
    """
    R = nA * bbox_attrs
    v = x_ref[...]                          # (nBblk, R, s_chunk) f32
    sig = jax.nn.sigmoid(v)                 # needed on 6/8 rows; EUP work is free under HBM roofline
    ex = jnp.exp(v)                         # needed on 2/8 rows; a possible inf on the other rows is
                                            # discarded by the select below (never multiplied by 0,
                                            # so no NaN can be produced).

    # Per-row (sublane) selection tables built from a tiny (R,1) iota and
    # scalar compile-time constants -- no constant tables, no extra DMA'd inputs.
    r = jax.lax.broadcasted_iota(jnp.int32, (R, 1), 0)
    gx_sel = jnp.zeros((R, 1), jnp.float32)
    gy_sel = jnp.zeros((R, 1), jnp.float32)
    sig_scale = jnp.ones((R, 1), jnp.float32)
    exp_scale = jnp.ones((R, 1), jnp.float32)
    exp_row = jnp.zeros((R, 1), jnp.bool_)
    for a in range(nA):                     # nA is small & static
        base = a * bbox_attrs
        is_x, is_y = (r == base), (r == base + 1)
        is_w, is_h = (r == base + 2), (r == base + 3)
        gx_sel = jnp.where(is_x, 1.0, gx_sel)
        gy_sel = jnp.where(is_y, 1.0, gy_sel)
        sig_scale = jnp.where(is_x | is_y, stride, sig_scale)
        exp_scale = jnp.where(is_w, anchors[a][0], exp_scale)
        exp_scale = jnp.where(is_h, anchors[a][1], exp_scale)
        exp_row = exp_row | is_w | is_h

    # Spatial cell offsets for this lane chunk from a lane iota.  The integer
    # div/mod by nG is done in f32 with a +0.5 guard (exact for S < 2**24).
    s0 = pl.program_id(1) * s_chunk
    lane = (jax.lax.broadcasted_iota(jnp.int32, (1, s_chunk), 1) + s0)
    lane = lane.astype(jnp.float32)
    gy = jnp.floor((lane + 0.5) * (1.0 / nG))             # (1, s_chunk)
    gx = lane - gy * nG
    grid_add = gx_sel * gx + gy_sel * gy                  # (R, s_chunk)

    out = jnp.where(exp_row, ex * exp_scale, (sig + grid_add) * sig_scale)
    o_ref[...] = out.astype(o_ref.dtype)                  # single dense full-tile store


def _largest_divisor_leq(n, cap):
    cap = max(1, min(n, cap))
    for d in range(cap, 0, -1):
        if n % d == 0:
            return d
    return 1


def yolo_layer_forward_lane_dense(x, anchors, num_classes, img_dim,
                                  out_dtype=jnp.float32):
    """Run the Pallas decode kernel; returns the lane-dense layout.

    x: (nB, nA*(5+num_classes), nG, nG) float32 (PyTorch NCHW).
    Returns out of shape (nB, nA*bbox_attrs, nG*nG).
    `out_dtype=jnp.bfloat16` halves HBM writeback if the consumer tolerates it
    (arithmetic stays f32 in-kernel).
    """
    nA = len(anchors)
    bbox_attrs = 5 + num_classes
    nB, C, nG, nG2 = x.shape
    assert nG == nG2 and C == nA * bbox_attrs
    S = nG * nG
    R = C
    stride = float(img_dim) / float(nG)

    # --- glue: contiguous (free) reshape to the kernel layout, no padding ---
    xr = x.reshape(nB, R, S).astype(jnp.float32)

    # Batch blocking: pack several images per grid step while keeping the
    # per-step input block <= ~2 MiB (in+out, double-buffered, stays well
    # under every generation's default scoped-VMEM limit, incl. v5e's 16 MiB).
    per_img_bytes = R * S * 4
    nBblk = _largest_divisor_leq(nB, max(1, (2 * 1024 * 1024) // max(per_img_bytes, 1)))

    # Optional lane split: only when S is 128-aligned and large.  Gives v7x's
    # second TensorCore work at small nB and deepens the DMA pipeline without
    # re-introducing pad/slice HBM copies for non-aligned grids (nG=13/26/52).
    s_chunk = S
    if S % 128 == 0 and S >= 2048:
        for c in range(1024, 127, -128):
            if S % c == 0:
                s_chunk = c
                break

    grid = (nB // nBblk, S // s_chunk)

    kernel = functools.partial(
        _yolo_kernel,
        nA=nA,
        bbox_attrs=bbox_attrs,
        nG=nG,
        stride=stride,
        anchors=tuple((float(aw), float(ah)) for aw, ah in anchors),
        s_chunk=s_chunk,
    )

    blk = (nBblk, R, s_chunk)   # last two dims are full-extent or 128-multiples
    out = pl.pallas_call(
        kernel,
        out_shape=jax.ShapeDtypeStruct((nB, R, S), out_dtype),
        grid_spec=pltpu.PrefetchScalarGridSpec(
            num_scalar_prefetch=0,
            grid=grid,
            in_specs=[pl.BlockSpec(blk, lambda b, s: (b, 0, s))],
            out_specs=pl.BlockSpec(blk, lambda b, s: (b, 0, s)),
        ),
        compiler_params=pltpu.CompilerParams(
            dimension_semantics=("parallel", "parallel"),
        ),
    )(xr)
    return out


def yolo_layer_forward(x, anchors, num_classes, img_dim):
    """YOLOLayer.forward (targets=None): returns (predictions, losses=None).

    predictions has the PyTorch layout (nB, nA*nG*nG, 5+num_classes).  The
    final transpose/reshape is plain XLA glue kept outside the kernel so it
    can fuse with downstream consumers; prefer the lane-dense output of
    `yolo_layer_forward_lane_dense` when the consumer can index it directly.
    """
    nA = len(anchors)
    bbox_attrs = 5 + num_classes
    nB, _, nG, _ = x.shape
    S = nG * nG
    out = yolo_layer_forward_lane_dense(x, anchors, num_classes, img_dim)
    predictions = (
        out.reshape(nB, nA, bbox_attrs, S)
        .transpose(0, 1, 3, 2)
        .reshape(nB, nA * S, bbox_attrs)
    )
    return predictions, None


def _reference_forward(x, anchors, num_classes, img_dim):
    """Plain-JAX re-implementation of the PyTorch forward (inference path)."""
    nA = len(anchors)
    bbox_attrs = 5 + num_classes
    nB, _, nG, _ = x.shape
    stride = float(img_dim) / float(nG)
    pred = x.reshape(nB, nA, bbox_attrs, nG, nG).transpose(0, 1, 3, 4, 2)
    sx = jax.nn.sigmoid(pred[..., 0])
    sy = jax.nn.sigmoid(pred[..., 1])
    w = pred[..., 2]
    h = pred[..., 3]
    conf = jax.nn.sigmoid(pred[..., 4])
    cls = jax.nn.sigmoid(pred[..., 5:])
    g = jnp.arange(nG, dtype=jnp.float32)
    grid_x = jnp.broadcast_to(g[None, :], (nG, nG))[None, None]
    grid_y = jnp.broadcast_to(g[:, None], (nG, nG))[None, None]
    sa = jnp.array([(aw / stride, ah / stride) for aw, ah in anchors], jnp.float32)
    aw = sa[:, 0].reshape(1, nA, 1, 1)
    ah = sa[:, 1].reshape(1, nA, 1, 1)
    bx = sx + grid_x
    by = sy + grid_y
    bw = jnp.exp(w) * aw
    bh = jnp.exp(h) * ah
    boxes = jnp.stack([bx, by, bw, bh], axis=-1)
    return jnp.concatenate(
        [
            boxes.reshape(nB, -1, 4) * stride,
            conf.reshape(nB, -1, 1),
            cls.reshape(nB, -1, num_classes),
        ],
        axis=-1,
    )


if __name__ == "__main__":
    anchors = [(10.0, 13.0), (16.0, 30.0), (33.0, 23.0)]
    num_classes = 3
    nA = len(anchors)
    bbox_attrs = 5 + num_classes  # 8

    key = jax.random.PRNGKey(0)
    k1, k2 = jax.random.split(key)

    # Case 1: 128-aligned spatial dim (nG=16 -> S=256).
    nB, nG, img_dim = 2, 16, 64
    x1 = jax.random.normal(k1, (nB, nA * bbox_attrs, nG, nG), dtype=jnp.float32)
    preds1, losses1 = yolo_layer_forward(x1, anchors, num_classes, img_dim)
    preds1 = jax.block_until_ready(preds1)
    ref1 = jax.block_until_ready(_reference_forward(x1, anchors, num_classes, img_dim))
    assert preds1.shape == (nB, nA * nG * nG, bbox_attrs), preds1.shape
    assert losses1 is None
    np.testing.assert_allclose(np.asarray(preds1), np.asarray(ref1), rtol=1e-5, atol=1e-5)

    # Case 2: non-128-aligned spatial dim (nG=13 -> S=169, full-extent lane block).
    nB, nG, img_dim = 2, 13, 416
    x2 = jax.random.normal(k2, (nB, nA * bbox_attrs, nG, nG), dtype=jnp.float32)
    preds2, _ = yolo_layer_forward(x2, anchors, num_classes, img_dim)
    preds2 = jax.block_until_ready(preds2)
    ref2 = jax.block_until_ready(_reference_forward(x2, anchors, num_classes, img_dim))
    assert preds2.shape == (nB, nA * nG * nG, bbox_attrs), preds2.shape
    np.testing.assert_allclose(np.asarray(preds2), np.asarray(ref2), rtol=1e-5, atol=1e-5)

    print("KERNEL_OK")
</pallas_src>

<mosaic_0001>
module attributes {stable_mosaic.version = 11 : i64} {
  func.func @_yolo_kernel(%arg0: i32, %arg1: i32, %arg2: memref<2x24x256xf32, #tpu.memory_space<vmem>>, %arg3: memref<2x24x256xf32, #tpu.memory_space<vmem>>) attributes {dimension_semantics = [#tpu.dimension_semantics<parallel>, #tpu.dimension_semantics<parallel>], iteration_bounds = array<i64: 1, 1>, scalar_prefetch = 0 : i64, scratch_operands = 0 : i64, tpu.core_type = #tpu.core_type<tc>, window_params = [{transform_indices = @transform_0, window_bounds = array<i64: 2, 24, 256>}, {transform_indices = @transform_1, window_bounds = array<i64: 2, 24, 256>}]} {
    %c0 = arith.constant 0 : index
    %c0_0 = arith.constant 0 : index
    %c0_1 = arith.constant 0 : index
    %0 = vector.load %arg2[%c0, %c0_0, %c0_1] : memref<2x24x256xf32, #tpu.memory_space<vmem>>, vector<2x24x256xf32>
    %1 = arith.negf %0 : vector<2x24x256xf32>
    %2 = math.exp %1 : vector<2x24x256xf32>
    %cst = arith.constant 1.000000e+00 : f32
    %3 = vector.broadcast %cst : f32 to vector<2x24x256xf32>
    %4 = arith.addf %3, %2 : vector<2x24x256xf32>
    %5 = arith.divf %3, %4 : vector<2x24x256xf32>
    %6 = math.exp %0 : vector<2x24x256xf32>
    %7 = tpu.iota {dimensions = array<i32: 0>} : vector<24x1xi32>
    %cst_2 = arith.constant 0.000000e+00 : f32
    %8 = vector.broadcast %cst_2 : f32 to vector<24x1xf32>
    %cst_3 = arith.constant 0.000000e+00 : f32
    %9 = vector.broadcast %cst_3 : f32 to vector<24x1xf32>
    %cst_4 = arith.constant 1.000000e+00 : f32
    %10 = vector.broadcast %cst_4 : f32 to vector<24x1xf32>
    %cst_5 = arith.constant 1.000000e+00 : f32
    %11 = vector.broadcast %cst_5 : f32 to vector<24x1xf32>
    %false = arith.constant false
    %12 = vector.broadcast %false : i1 to vector<24x1xi1>
    %c0_i32 = arith.constant 0 : i32
    %13 = vector.broadcast %c0_i32 : i32 to vector<24x1xi32>
    %14 = arith.cmpi eq, %7, %13 : vector<24x1xi32>
    %c1_i32 = arith.constant 1 : i32
    %15 = vector.broadcast %c1_i32 : i32 to vector<24x1xi32>
    %16 = arith.cmpi eq, %7, %15 : vector<24x1xi32>
    %c2_i32 = arith.constant 2 : i32
    %17 = vector.broadcast %c2_i32 : i32 to vector<24x1xi32>
    %18 = arith.cmpi eq, %7, %17 : vector<24x1xi32>
    %c3_i32 = arith.constant 3 : i32
    %19 = vector.broadcast %c3_i32 : i32 to vector<24x1xi32>
    %20 = arith.cmpi eq, %7, %19 : vector<24x1xi32>
    %cst_6 = arith.constant 1.000000e+00 : f32
    %21 = vector.broadcast %cst_6 : f32 to vector<24x1xf32>
    %22 = arith.select %14, %21, %8 : vector<24x1xi1>, vector<24x1xf32>
    %cst_7 = arith.constant 1.000000e+00 : f32
    %23 = vector.broadcast %cst_7 : f32 to vector<24x1xf32>
    %24 = arith.select %16, %23, %9 : vector<24x1xi1>, vector<24x1xf32>
    %25 = arith.ori %14, %16 : vector<24x1xi1>
    %cst_8 = arith.constant 4.000000e+00 : f32
    %26 = vector.broadcast %cst_8 : f32 to vector<24x1xf32>
    %27 = arith.select %25, %26, %10 : vector<24x1xi1>, vector<24x1xf32>
    %cst_9 = arith.constant 1.000000e+01 : f32
    %28 = vector.broadcast %cst_9 : f32 to vector<24x1xf32>
    %29 = arith.select %18, %28, %11 : vector<24x1xi1>, vector<24x1xf32>
    %cst_10 = arith.constant 1.300000e+01 : f32
    %30 = vector.broadcast %cst_10 : f32 to vector<24x1xf32>
    %31 = arith.select %20, %30, %29 : vector<24x1xi1>, vector<24x1xf32>
    %32 = arith.ori %12, %18 : vector<24x1xi1>
    %33 = arith.ori %32, %20 : vector<24x1xi1>
    %c8_i32 = arith.constant 8 : i32
    %34 = vector.broadcast %c8_i32 : i32 to vector<24x1xi32>
    %35 = arith.cmpi eq, %7, %34 : vector<24x1xi32>
    %c9_i32 = arith.constant 9 : i32
    %36 = vector.broadcast %c9_i32 : i32 to vector<24x1xi32>
    %37 = arith.cmpi eq, %7, %36 : vector<24x1xi32>
    %c10_i32 = arith.constant 10 : i32
    %38 = vector.broadcast %c10_i32 : i32 to vector<24x1xi32>
    %39 = arith.cmpi eq, %7, %38 : vector<24x1xi32>
    %c11_i32 = arith.constant 11 : i32
    %40 = vector.broadcast %c11_i32 : i32 to vector<24x1xi32>
    %41 = arith.cmpi eq, %7, %40 : vector<24x1xi32>
    %cst_11 = arith.constant 1.000000e+00 : f32
    %42 = vector.broadcast %cst_11 : f32 to vector<24x1xf32>
    %43 = arith.select %35, %42, %22 : vector<24x1xi1>, vector<24x1xf32>
    %cst_12 = arith.constant 1.000000e+00 : f32
    %44 = vector.broadcast %cst_12 : f32 to vector<24x1xf32>
    %45 = arith.select %37, %44, %24 : vector<24x1xi1>, vector<24x1xf32>
    %46 = arith.ori %35, %37 : vector<24x1xi1>
    %cst_13 = arith.constant 4.000000e+00 : f32
    %47 = vector.broadcast %cst_13 : f32 to vector<24x1xf32>
    %48 = arith.select %46, %47, %27 : vector<24x1xi1>, vector<24x1xf32>
    %cst_14 = arith.constant 1.600000e+01 : f32
    %49 = vector.broadcast %cst_14 : f32 to vector<24x1xf32>
    %50 = arith.select %39, %49, %31 : vector<24x1xi1>, vector<24x1xf32>
    %cst_15 = arith.constant 3.000000e+01 : f32
    %51 = vector.broadcast %cst_15 : f32 to vector<24x1xf32>
    %52 = arith.select %41, %51, %50 : vector<24x1xi1>, vector<24x1xf32>
    %53 = arith.ori %33, %39 : vector<24x1xi1>
    %54 = arith.ori %53, %41 : vector<24x1xi1>
    %c16_i32 = arith.constant 16 : i32
    %55 = vector.broadcast %c16_i32 : i32 to vector<24x1xi32>
    %56 = arith.cmpi eq, %7, %55 : vector<24x1xi32>
    %c17_i32 = arith.constant 17 : i32
    %57 = vector.broadcast %c17_i32 : i32 to vector<24x1xi32>
    %58 = arith.cmpi eq, %7, %57 : vector<24x1xi32>
    %c18_i32 = arith.constant 18 : i32
    %59 = vector.broadcast %c18_i32 : i32 to vector<24x1xi32>
    %60 = arith.cmpi eq, %7, %59 : vector<24x1xi32>
    %c19_i32 = arith.constant 19 : i32
    %61 = vector.broadcast %c19_i32 : i32 to vector<24x1xi32>
    %62 = arith.cmpi eq, %7, %61 : vector<24x1xi32>
    %cst_16 = arith.constant 1.000000e+00 : f32
    %63 = vector.broadcast %cst_16 : f32 to vector<24x1xf32>
    %64 = arith.select %56, %63, %43 : vector<24x1xi1>, vector<24x1xf32>
    %cst_17 = arith.constant 1.000000e+00 : f32
    %65 = vector.broadcast %cst_17 : f32 to vector<24x1xf32>
    %66 = arith.select %58, %65, %45 : vector<24x1xi1>, vector<24x1xf32>
    %67 = arith.ori %56, %58 : vector<24x1xi1>
    %cst_18 = arith.constant 4.000000e+00 : f32
    %68 = vector.broadcast %cst_18 : f32 to vector<24x1xf32>
    %69 = arith.select %67, %68, %48 : vector<24x1xi1>, vector<24x1xf32>
    %cst_19 = arith.constant 3.300000e+01 : f32
    %70 = vector.broadcast %cst_19 : f32 to vector<24x1xf32>
    %71 = arith.select %60, %70, %52 : vector<24x1xi1>, vector<24x1xf32>
    %cst_20 = arith.constant 2.300000e+01 : f32
    %72 = vector.broadcast %cst_20 : f32 to vector<24x1xf32>
    %73 = arith.select %62, %72, %71 : vector<24x1xi1>, vector<24x1xf32>
    %74 = arith.ori %54, %60 : vector<24x1xi1>
    %75 = arith.ori %74, %62 : vector<24x1xi1>
    %c256_i32 = arith.constant 256 : i32
    %76 = arith.muli %arg1, %c256_i32 : i32
    %77 = tpu.iota {dimensions = array<i32: 1>} : vector<1x256xi32>
    %78 = vector.broadcast %76 : i32 to vector<1x256xi32>
    %79 = arith.addi %77, %78 : vector<1x256xi32>
    %80 = arith.sitofp %79 : vector<1x256xi32> to vector<1x256xf32>
    %cst_21 = arith.constant 5.000000e-01 : f32
    %81 = vector.broadcast %cst_21 : f32 to vector<1x256xf32>
    %82 = arith.addf %80, %81 : vector<1x256xf32>
    %cst_22 = arith.constant 6.250000e-02 : f32
    %83 = vector.broadcast %cst_22 : f32 to vector<1x256xf32>
    %84 = arith.mulf %82, %83 : vector<1x256xf32>
    %85 = math.floor %84 : vector<1x256xf32>
    %cst_23 = arith.constant 1.600000e+01 : f32
    %86 = vector.broadcast %cst_23 : f32 to vector<1x256xf32>
    %87 = arith.mulf %85, %86 : vector<1x256xf32>
    %88 = arith.subf %80, %87 : vector<1x256xf32>
    %89 = vector.broadcast %64 : vector<24x1xf32> to vector<24x256xf32>
    %90 = vector.broadcast %88 : vector<1x256xf32> to vector<24x256xf32>
    %91 = arith.mulf %89, %90 : vector<24x256xf32>
    %92 = vector.broadcast %66 : vector<24x1xf32> to vector<24x256xf32>
    %93 = vector.broadcast %85 : vector<1x256xf32> to vector<24x256xf32>
    %94 = arith.mulf %92, %93 : vector<24x256xf32>
    %95 = arith.addf %91, %94 : vector<24x256xf32>
    %96 = vector.shape_cast %73 : vector<24x1xf32> to vector<1x24x1xf32>
    %97 = vector.broadcast %96 : vector<1x24x1xf32> to vector<2x24x256xf32>
    %98 = arith.mulf %6, %97 : vector<2x24x256xf32>
    %99 = vector.shape_cast %95 : vector<24x256xf32> to vector<1x24x256xf32>
    %100 = vector.broadcast %99 : vector<1x24x256xf32> to vector<2x24x256xf32>
    %101 = arith.addf %5, %100 : vector<2x24x256xf32>
    %102 = vector.shape_cast %69 : vector<24x1xf32> to vector<1x24x1xf32>
    %103 = vector.broadcast %102 : vector<1x24x1xf32> to vector<2x24x256xf32>
    %104 = arith.mulf %101, %103 : vector<2x24x256xf32>
    %105 = vector.shape_cast %75 : vector<24x1xi1> to vector<1x24x1xi1>
    %106 = vector.broadcast %105 : vector<1x24x1xi1> to vector<2x24x256xi1>
    %107 = arith.select %106, %98, %104 : vector<2x24x256xi1>, vector<2x24x256xf32>
    %c0_24 = arith.constant 0 : index
    %c0_25 = arith.constant 0 : index
    %c0_26 = arith.constant 0 : index
    %108 = vector.load %arg3[%c0_24, %c0_25, %c0_26] : memref<2x24x256xf32, #tpu.memory_space<vmem>>, vector<2x24x256xf32>
    tpu.vector_store %arg3[%c0_24, %c0_25, %c0_26], %107 {strides = array<i32>} : memref<2x24x256xf32, #tpu.memory_space<vmem>>, vector<2x24x256xf32>,
    return
  }
  func.func @transform_0(%arg0: i32, %arg1: i32) -> (i32, i32, i32) {
    %c0_i32 = arith.constant 0 : i32
    %c0_i32_0 = arith.constant 0 : i32
    return %arg0, %c0_i32, %arg1 : i32, i32, i32
  }
  func.func @transform_1(%arg0: i32, %arg1: i32) -> (i32, i32, i32) {
    %c0_i32 = arith.constant 0 : i32
    %c0_i32_0 = arith.constant 0 : i32
    return %arg0, %c0_i32, %arg1 : i32, i32, i32
  }
}

</mosaic_0001>

<bundles_post_ra>
// kernel: tpu_custom_call.1
= control target key start
LH: loop header
LB: loop body
LE: loop exit
PB: predicated region body
PF: predicated region fallthrough
CT: control target
= control target key end

     0   :  { %6 = vsyncpa [#allocation3], 0  ;;  %s767_s0 = inlined_call_operand.hbm [shape: f32[2,24,256], index: 0, kind: input, shape index: {}]   ;;  %s768_s1 = inlined_call_operand.hbm [shape: f32[2,24,256], index: 1, kind: output, shape index: {}]  }
   0x1   :  { %7 = vsyncpa [#allocation4], 0  ;;  %s494_s6 = smov [#allocation2]  }
   0x2   :  { %s13_s7 = sshll.u32 %s494_s6, 4  ;;  %s14_s7 = int_to_ptr.vmem [resolvable:$true] %s13_s7 }
   0x3   :  { %s458_s8 = scalar_lea.vmem %s14_s7, 1536  ;;  %p463_p1 = scmp.lt.s32.totalorder %s14_s7, %s14_s7 }
   0x4   :  { %p459_p0 = scmp.ne.s32.totalorder %s14_s7, %s458_s8  ;;  %p464_p2 = scmp.lt.s32.totalorder %s458_s8, %s458_s8 }
   0x6   :  { %p465_p3 = por %p464_p2, %p463_p1 }
   0x8   :  { %p466_p4 = pnand %p465_p3, %p459_p0 }
   0xa   :  { %469 = shalt.err (!%p466_p4)
}
   0xb   :  { %s495_s9 = smov 256   ;;  %s496_s10 = smov 16  }
   0xc   :  { %19 = dma.hbm_to_vmem [thread:$0]  %s767_s0, 1536, %s14_s7, [#allocation3], %s495_s9, %s495_s9, %s496_s10  }
   0xd   :  { %490 = dma.done.wait [#allocation3], 1536  }
   0xe   :  { %491 = vsyncadd [#allocation3], 4294965760  ;;  %v131_v0 = vlaneseq  ;;  %v23_v3 = vld [vmem:[#allocation2] sm:$0xff]  ;;  %v24_v4 = vld [vmem:[#allocation2 + $0x8] sm:$0xff]  ;;  %v497_v26 = vmov 1.0   ;;  %v498_v35 = vmov 0.0  }
   0xf   :  { %v25_v5 = vld [vmem:[#allocation2 + $0x10] sm:$0xff]  ;;  %v360_v6 = vmul.f32 -1.442695, %v23_v3  ;;  %v361_v8 = vmul.f32 -1.442695, %v24_v4  ;;  %v26_v12 = vld [vmem:[#allocation2 + $0x18] sm:$0xff] }
  0x10   :  { %v516_v1 = vand.u32 127, %v131_v0  ;;  %v362_v10 = vmul.f32 -1.442695, %v25_v5  ;;  %v27_v14 = vld [vmem:[#allocation2 + $0x20] sm:$0xff]  ;;  %v363_v15 = vmul.f32 -1.442695, %v26_v12 }
  0x11   :  { %378 = vpow2.f32 %v360_v6  ;;  %v525_v17 = vshrl.u32 %v131_v0, 7  ;;  %v364_v18 = vmul.f32 -1.442695, %v27_v14  ;;  %v107_v19 = vmul.f32 1.442695, %v23_v3  ;;  %v530_v24 = vld [vmem:[#allocation2 + $0x28] sm:$0xff] }
  0x12   :  { %v519_v2 = vadd.s32 128, %v516_v1  ;;  %v247_v7 = vcvt.s32.f32 %v516_v1  ;;  %380 = vpow2.f32 %v361_v8  ;;  %v109_v21 = vmul.f32 1.442695, %v24_v4  ;;  %v548_v29 = vld [vmem:[#allocation2 + $0x30] sm:$0xff]  ;;  %v567_v42 = vld [vmem:[#allocation2 + $0x38] sm:$0xff]  ;;  %v588_v52 = vld [vmem:[#allocation2 + $0x40] sm:$0xff] }
  0x13   :  { %382 = vpow2.f32 %v362_v10  ;;  %vm141_vm0 = vcmp.eq.s32.totalorder %v525_v17, 2  ;;  %v111_v23 = vmul.f32 1.442695, %v25_v5  ;;  %vm135_vm1 = vcmp.eq.s32.totalorder %v525_v17, 0  ;;  %v604_v60 = vld [vmem:[#allocation2 + $0x48] sm:$0xff]  ;;  %v613_v4 = vld [vmem:[#allocation2 + $0x50] sm:$0xff] }
  0x14   :  { %v248_v9 = vcvt.s32.f32 %v519_v2  ;;  %v249_v11 = vadd.f32 0.5, %v247_v7  ;;  %384 = vpow2.f32 %v363_v15  ;;  %vm138_vm2 = vcmp.eq.s32.totalorder %v525_v17, 1  ;;  %v629_v15 = vld [vmem:[#allocation2 + $0x58] sm:$0xff]  ;;  %s499_s0 = smov [#allocation5]  }
  0x15   :  { %386 = vpow2.f32 %v364_v18  ;;  %vm144_vm3 = vcmp.eq.s32.totalorder %v525_v17, 3  ;;  %vm539_vm4 = vmor %vm135_vm1, %vm138_vm2  ;;  %v159_v27 = vsel %vm141_vm0, 10.0, %v497_v26  ;;  %v551_v31 = vadd.s32 8, %v525_v17  ;;  %s348_s13 = sshll.u32 %s499_s0, 4  ;;  %s349_s13 = int_to_ptr.vmem [resolvable:$true] %s348_s13 }
  0x16   :  { %v250_v13 = vadd.f32 0.5, %v248_v9  ;;  %v251_v16 = vmul.f32 0.0625, %v249_v11  ;;  %388 = vpow2.f32 %v107_v19  ;;  %v113_v32 = vmul.f32 1.442695, %v26_v12  ;;  %vm655_vm14 = vmor %vm141_vm0, %vm144_vm3  ;;  %s470_s14 = scalar_lea.vmem %s349_s13, 1536  ;;  %p475_p6 = scmp.lt.s32.totalorder %s349_s13, %s349_s13 }
  0x17   :  { %390 = vpow2.f32 %v109_v21  ;;  %v365_v33 = vmul.f32 -1.442695, %v530_v24  ;;  %v147_v36 = vsel %vm135_vm1, 1.0, %v498_v35  ;;  %v150_v39 = vsel %vm138_vm2, 1.0, %v498_v35  ;;  %p471_p5 = scmp.ne.s32.totalorder %s349_s13, %s470_s14  ;;  %p476_p7 = scmp.lt.s32.totalorder %s470_s14, %s470_s14 }
  0x18   :  { %v252_v20 = vmul.f32 0.0625, %v250_v13  ;;  %v528_v22 = vfloor.f32 %v251_v16  ;;  %392 = vpow2.f32 %v111_v23  ;;  %v564_v40 = vsel %vm539_vm4, 4.0, %v497_v26 }
  0x19   :  { %394 = vpow2.f32 %v365_v33  ;;  %v366_v41 = vmul.f32 -1.442695, %v548_v29  ;;  %v571_v43 = vsel %vm144_vm3, 13.0, %v159_v27  ;;  %vm169_vm5 = vcmp.eq.s32.totalorder %v551_v31, 8  ;;  %p477_p8 = por %p476_p7, %p475_p6 }
  0x1a   :  { %v546_v28 = vfloor.f32 %v252_v20  ;;  %v255_v37 = vmul.f32 16.0, %v528_v22  ;;  %vm172_vm6 = vcmp.eq.s32.totalorder %v551_v31, 9  ;;  %v115_v47 = vmul.f32 1.442695, %v27_v14 }
  0x1b   :  { %vm187_vm7 = vmor %vm169_vm5, %vm172_vm6  ;;  %v367_v50 = vmul.f32 -1.442695, %v567_v42  ;;  %vm175_vm8 = vcmp.eq.s32.totalorder %v551_v31, 10  ;;  %vm178_vm9 = vcmp.eq.s32.totalorder %v551_v31, 11  ;;  %v586_v51 = vadd.s32 16, %v525_v17  ;;  %p478_p9 = pnand %p477_p8, %p471_p5 }
  0x1c   :  { %v256_v45 = vmul.f32 16.0, %v546_v28  ;;  %v576_v48 = vsub.f32 %v247_v7, %v255_v37  ;;  %v181_v55 = vsel %vm169_vm5, 1.0, %v498_v35  ;;  %v184_v56 = vsel %vm172_vm6, 1.0, %v498_v35  ;;  %vm678_vm15 = vmor %vm175_vm8, %vm178_vm9 }
  0x1d   :  { %v265_v57 = vmul.f32 %v528_v22, %v150_v39  ;;  %v602_v58 = vsel %vm187_vm7, 4.0, %v497_v26  ;;  %v193_v63 = vsel %vm175_vm8, 16.0, %v497_v26  ;;  %v368_v0 = vmul.f32 -1.442695, %v588_v52 }
  0x1e   :  { %v379_v30 = vpop.eup %378  ;;  %v592_v54 = vsub.f32 %v248_v9, %v256_v45  ;;  %v259_v62 = vmul.f32 %v576_v48, %v147_v36  ;;  %v261_v1 = vmul.f32 %v576_v48, %v181_v55  ;;  %v267_v2 = vmul.f32 %v528_v22, %v184_v56 }
  0x1f   :  { %v71_v34 = vadd.f32 1.0, %v379_v30  ;;  %v381_v38 = vpop.eup %380  ;;  %v266_v6 = vmul.f32 %v546_v28, %v150_v39  ;;  %vm206_vm10 = vcmp.eq.s32.totalorder %v586_v51, 16  ;;  %v369_v7 = vmul.f32 -1.442695, %v604_v60 }
  0x20   :  { %v72_v44 = vadd.f32 1.0, %v381_v38  ;;  %v383_v46 = vpop.eup %382  ;;  %v260_v5 = vmul.f32 %v592_v54, %v147_v36  ;;  %v621_v9 = vsel %vm178_vm9, 30.0, %v193_v63  ;;  %vm209_vm11 = vcmp.eq.s32.totalorder %v586_v51, 17 }
  0x21   :  { %396 = vrcp.f32 %v71_v34  ;;  %v73_v49 = vadd.f32 1.0, %v383_v46  ;;  %v385_v53 = vpop.eup %384  ;;  %v117_v10 = vmul.f32 1.442695, %v530_v24  ;;  %v625_v12 = vadd.f32 %v265_v57, %v259_v62  ;;  %vm688_vm0 = vmor %vm206_vm10, %vm209_vm11 }
  0x22   :  { %398 = vpow2.f32 %v113_v32  ;;  %v74_v59 = vadd.f32 1.0, %v385_v53  ;;  %v387_v61 = vpop.eup %386  ;;  %v268_v13 = vmul.f32 %v546_v28, %v184_v56  ;;  %v370_v14 = vmul.f32 -1.442695, %v613_v4 }
  0x23   :  { %400 = vrcp.f32 %v72_v44  ;;  %v75_v3 = vadd.f32 1.0, %v387_v61  ;;  %v389_v8 = vpop.eup %388  ;;  %v631_v18 = vadd.f32 %v267_v2, %v261_v1  ;;  %v262_v19 = vmul.f32 %v592_v54, %v181_v55 }
  0x24   :  { %402 = vpow2.f32 %v366_v41  ;;  %v391_v11 = vpop.eup %390  ;;  %vm212_vm12 = vcmp.eq.s32.totalorder %v586_v51, 18  ;;  %v218_v20 = vsel %vm206_vm10, 1.0, %v498_v35  ;;  %v638_v23 = vadd.f32 %v266_v6, %v260_v5 }
  0x25   :  { %404 = vrcp.f32 %v73_v49  ;;  %v393_v16 = vpop.eup %392  ;;  %v221_v24 = vsel %vm209_vm11, 1.0, %v498_v35  ;;  %v119_v25 = vmul.f32 1.442695, %v548_v29  ;;  %vm215_vm13 = vcmp.eq.s32.totalorder %v586_v51, 19 }
  0x26   :  { %406 = vpow2.f32 %v115_v47  ;;  %v395_v21 = vpop.eup %394  ;;  %v371_v32 = vmul.f32 -1.442695, %v629_v15  ;;  %v277_v34 = vmul.f32 %v389_v8, %v571_v43  ;;  %v230_v37 = vsel %vm212_vm12, 33.0, %v497_v26  ;;  %vm718_vm1 = vmor %vm212_vm12, %vm215_vm13 }
  0x27   :  { %408 = vpow2.f32 %v367_v50  ;;  %v76_v30 = vadd.f32 1.0, %v395_v21  ;;  %v278_v38 = vmul.f32 %v391_v11, %v571_v43  ;;  %v263_v39 = vmul.f32 %v576_v48, %v218_v20 }
  0x28   :  { %410 = vrcp.f32 %v74_v59  ;;  %v269_v41 = vmul.f32 %v528_v22, %v221_v24  ;;  %v121_v47 = vmul.f32 1.442695, %v567_v42  ;;  %v665_v49 = vadd.f32 %v268_v13, %v262_v19 }
  0x29   :  { %412 = vrcp.f32 %v75_v3  ;;  %v669_v50 = vsel %vm215_vm13, 23.0, %v230_v37  ;;  %v279_v56 = vmul.f32 %v393_v16, %v621_v9  ;;  %v264_v31 = vmul.f32 %v592_v54, %v218_v20 }
  0x2a   :  { %414 = vpow2.f32 %v368_v0  ;;  %v692_v62 = vadd.f32 %v269_v41, %v263_v39  ;;  %v123_v63 = vmul.f32 1.442695, %v588_v52  ;;  %v125_v54 = vmul.f32 1.442695, %v604_v60 }
  0x2b   :  { %416 = vpow2.f32 %v369_v7  ;;  %v270_v7 = vmul.f32 %v546_v28, %v221_v24  ;;  %v127_v60 = vmul.f32 1.442695, %v613_v4 }
  0x2c   :  { %418 = vpow2.f32 %v117_v10  ;;  %v708_v10 = vsel %vm688_vm0, 4.0, %v497_v26 }
  0x2d   :  { %420 = vpow2.f32 %v370_v14  ;;  %v276_v24 = vadd.f32 %v270_v7, %v264_v31 }
  0x2e   :  { %v397_v27 = vpop.eup %396  ;;  %422 = vrcp.f32 %v76_v30  ;;  %v129_v30 = vmul.f32 1.442695, %v629_v15 }
  0x2f   :  { %v399_v33 = vpop.eup %398  ;;  %v289_v36 = vadd.f32 %v397_v27, %v625_v12  ;;  %424 = vpow2.f32 %v119_v25 }
  0x30   :  { %v401_v35 = vpop.eup %400  ;;  %426 = vpow2.f32 %v371_v32  ;;  %v280_v5 = vmul.f32 %v399_v33, %v621_v9 }
  0x31   :  { %v403_v44 = vpop.eup %402  ;;  %v301_v45 = vmul.f32 %v289_v36, %v564_v40  ;;  %v290_v46 = vadd.f32 %v401_v35, %v638_v23 }
  0x32   :  { %v405_v17 = vpop.eup %404  ;;  %v77_v53 = vadd.f32 1.0, %v403_v44 }
  0x33   :  { %v407_v48 = vpop.eup %406  ;;  %v319_v22 = vsel %vm655_vm14, %v277_v34, %v301_v45  ;;  %v302_v55 = vmul.f32 %v290_v46, %v564_v40  ;;  %v291_v57 = vadd.f32 %v405_v17, %v631_v18 }
  0x34   :  { %v409_v59 = vpop.eup %408  ;;  %331 = vst [vmem:[#allocation5] sm:$0xff] %v319_v22  ;;  %428 = vrcp.f32 %v77_v53  ;;  %v281_v14 = vmul.f32 %v407_v48, %v669_v50 }
  0x35   :  { %v411_v0 = vpop.eup %410  ;;  %v320_v1 = vsel %vm655_vm14, %v278_v38, %v302_v55  ;;  %v303_v2 = vmul.f32 %v291_v57, %v602_v58  ;;  %v78_v3 = vadd.f32 1.0, %v409_v59  ;;  %430 = vpow2.f32 %v121_v47 }
  0x36   :  { %332 = vst [vmem:[#allocation5 + $0x8] sm:$0xff] %v320_v1  ;;  %v292_v6 = vadd.f32 %v411_v0, %v665_v49  ;;  %v413_v8 = vpop.eup %412 }
  0x37   :  { %v321_v52 = vsel %vm678_vm15, %v279_v56, %v303_v2  ;;  %432 = vrcp.f32 %v78_v3  ;;  %v415_v11 = vpop.eup %414  ;;  %v293_v28 = vadd.f32 %v413_v8, %v692_v62 }
  0x38   :  { %333 = vst [vmem:[#allocation5 + $0x10] sm:$0xff] %v321_v52  ;;  %v304_v13 = vmul.f32 %v292_v6, %v602_v58  ;;  %v79_v26 = vadd.f32 1.0, %v415_v11  ;;  %434 = vpow2.f32 %v123_v63  ;;  %v417_v19 = vpop.eup %416 }
  0x39   :  { %v305_v21 = vmul.f32 %v293_v28, %v708_v10  ;;  %436 = vpow2.f32 %v125_v54  ;;  %v419_v25 = vpop.eup %418  ;;  %v80_v4 = vadd.f32 1.0, %v417_v19 }
  0x3a   :  { %v322_v20 = vsel %vm678_vm15, %v280_v5, %v304_v13  ;;  %438 = vrcp.f32 %v79_v26  ;;  %v421_v27 = vpop.eup %420  ;;  %v282_v36 = vmul.f32 %v419_v25, %v669_v50 }
  0x3b   :  { %334 = vst [vmem:[#allocation5 + $0x18] sm:$0xff] %v322_v20  ;;  %v323_v51 = vsel %vm718_vm1, %v281_v14, %v305_v21  ;;  %440 = vpow2.f32 %v127_v60  ;;  %v423_v32 = vpop.eup %422  ;;  %v81_v33 = vadd.f32 1.0, %v421_v27 }
  0x3c   :  { %335 = vst [vmem:[#allocation5 + $0x20] sm:$0xff] %v323_v51  ;;  %442 = vrcp.f32 %v80_v4  ;;  %v425_v34 = vpop.eup %424  ;;  %v294_v37 = vadd.f32 %v423_v32, %v276_v24 }
  0x3d   :  { %v427_v35 = vpop.eup %426  ;;  %444 = vrcp.f32 %v81_v33  ;;  %v283_v15 = vmul.f32 %v425_v34, %v571_v43 }
  0x3e   :  { %v306_v38 = vmul.f32 %v294_v37, %v708_v10  ;;  %v82_v39 = vadd.f32 1.0, %v427_v35  ;;  %446 = vpow2.f32 %v129_v30 }
  0x40   :  { %v324_v45 = vsel %vm718_vm1, %v282_v36, %v306_v38  ;;  %448 = vrcp.f32 %v82_v39 }
  0x41   :  { %v429_v41 = vpop.eup %428  ;;  %336 = vst [vmem:[#allocation5 + $0x28] sm:$0xff] %v324_v45 }
  0x42   :  { %v431_v44 = vpop.eup %430  ;;  %v295_v46 = vadd.f32 %v429_v41, %v625_v12 }
  0x43   :  { %v284_v53 = vmul.f32 %v431_v44, %v571_v43 }
  0x44   :  { %v433_v47 = vpop.eup %432  ;;  %v307_v17 = vmul.f32 %v295_v46, %v564_v40 }
  0x45   :  { %v296_v48 = vadd.f32 %v433_v47, %v638_v23  ;;  %v435_v22 = vpop.eup %434 }
  0x46   :  { %v325_v55 = vsel %vm655_vm14, %v283_v15, %v307_v17  ;;  %v437_v56 = vpop.eup %436  ;;  %v285_v31 = vmul.f32 %v435_v22, %v621_v9 }
  0x47   :  { %337 = vst [vmem:[#allocation5 + $0x30] sm:$0xff] %v325_v55  ;;  %v308_v57 = vmul.f32 %v296_v48, %v564_v40  ;;  %v439_v59 = vpop.eup %438  ;;  %v286_v0 = vmul.f32 %v437_v56, %v621_v9 }
  0x48   :  { %v441_v61 = vpop.eup %440  ;;  %v297_v63 = vadd.f32 %v439_v59, %v631_v18 }
  0x49   :  { %v326_v12 = vsel %vm655_vm14, %v284_v53, %v308_v57  ;;  %v443_v43 = vpop.eup %442  ;;  %v287_v5 = vmul.f32 %v441_v61, %v669_v50 }
  0x4a   :  { %338 = vst [vmem:[#allocation5 + $0x38] sm:$0xff] %v326_v12  ;;  %v309_v23 = vmul.f32 %v297_v63, %v602_v58  ;;  %v298_v1 = vadd.f32 %v443_v43, %v665_v49  ;;  %v445_v2 = vpop.eup %444 }
  0x4b   :  { %v447_v3 = vpop.eup %446  ;;  %v299_v6 = vadd.f32 %v445_v2, %v692_v62 }
  0x4c   :  { %v327_v40 = vsel %vm678_vm15, %v285_v31, %v309_v23  ;;  %v310_v29 = vmul.f32 %v298_v1, %v602_v58  ;;  %v288_v49 = vmul.f32 %v447_v3, %v669_v50 }
  0x4d   :  { %339 = vst [vmem:[#allocation5 + $0x40] sm:$0xff] %v327_v40  ;;  %v449_v18 = vpop.eup %448  ;;  %v311_v9 = vmul.f32 %v299_v6, %v708_v10 }
  0x4e   :  { %v328_v7 = vsel %vm678_vm15, %v286_v0, %v310_v29  ;;  %v300_v54 = vadd.f32 %v449_v18, %v276_v24 }
  0x4f   :  { %340 = vst [vmem:[#allocation5 + $0x48] sm:$0xff] %v328_v7  ;;  %v329_v58 = vsel %vm718_vm1, %v287_v5, %v311_v9 }
  0x50   :  { %341 = vst [vmem:[#allocation5 + $0x50] sm:$0xff] %v329_v58  ;;  %v312_v8 = vmul.f32 %v300_v54, %v708_v10 }
  0x52   :  { %v330_v62 = vsel %vm718_vm1, %v288_v49, %v312_v8 }
  0x53   :  { %342 = vst [vmem:[#allocation5 + $0x58] sm:$0xff] %v330_v62 }
  0x54   :  { %481 = shalt.err (!%p478_p9)
}
  0x55   :  { %354 = dma.vmem_to_hbm [thread:$0]  %s349_s13, 1536, %s768_s1, [#allocation4], %s495_s9, %s495_s9, %s496_s10  }
  0x56   :  { %492 = dma.done.wait [#allocation4], 1536  }
  0x57   :  { %493 = vsyncadd [#allocation4], 4294965760 }
  0x58   :  { %358 = vsyncpa [#allocation3], 1 }
  0x59   :  { %359 = vsyncpa [#allocation4], 1 }

</bundles_post_ra>
